<compile_context>
chip_gen: v6e
topology: v6e:2x2x1
jax: 0.10.0
libtpu: 0.0.40
codegen_flags: <defaults>
</compile_context>

<pallas_src>
import functools

import jax
import jax.numpy as jnp
import numpy as np
from jax import lax
from jax.experimental import pallas as pl
from jax.experimental.pallas import tpu as pltpu

_LANES = 128
_TILE_BYTES = 1 << 20        # ~1 MiB of input rows per grid step: 2048 f32 / 4096 bf16 rows
_QUAT_TILE_B = 32768         # lanes per grid step for the lane-dense quat kernel


def _cdiv(a, b):
    return -(-a // b)


def _roundup8(x):
    return ((x + 7) // 8) * 8


def _num_tensorcores():
    """>=2 on chips where a 'parallel' grid axis is split across TensorCores, else 1."""
    try:
        kind = jax.devices()[0].device_kind.lower()
    except Exception:
        return 1
    if 'v7' in kind or '7x' in kind or 'v4' in kind or 'v5p' in kind:
        return 2
    return 1


# ---------------------------------------------------------------------------
# Pointwise terms: loss = scale * sum(term) / denom
# ---------------------------------------------------------------------------
def _pointwise_term(p, l, mode, beta):
    if mode == 'L2':            # nn.MSELoss
        d = p - l
        return d * d
    if mode == 'L1':            # nn.L1Loss
        return jnp.abs(p - l)
    if mode == 'SmoothL1':      # nn.SmoothL1Loss
        d = p - l
        ad = jnp.abs(d)
        return jnp.where(ad < beta, 0.5 * d * d / beta, ad - 0.5 * beta)
    if mode == 'CE':            # -mean(sum(label*pre, dim=1))  -> term = l*p, scale = -1
        return l * p
    if mode == 'KL':            # F.kl_div(pre, label, 'batchmean') -> sum(l*(log l - p)) / B
        safe_l = jnp.where(l > 0, l, 1.0)
        return jnp.where(l > 0, l * (jnp.log(safe_l) - p), 0.0)
    if mode == 'JS':            # 0.5*(kl(pre,m)+kl(log(label+1e-6),m)), m = 0.5*(exp(pre)+label)
        m = 0.5 * (jnp.exp(p) + l)
        return m * (2.0 * jnp.log(m) - p - jnp.log(l + 1e-6))
    raise ValueError(f'Unknown pointwise mode: {mode}')


# ---------------------------------------------------------------------------
# Tiled global-sum reduction kernel (optionally grouped: G losses in one call)
# ---------------------------------------------------------------------------
def _reduce_sum_kernel(p_ref, l_ref, out_ref, acc_ref, *, mode, beta, n_valid,
                       tile_rows, bps, first_partial_blk, needs_mask,
                       scale_over_denom):
    t = pl.program_id(2)                       # reduction axis (innermost, "arbitrary")

    @pl.when(t == 0)
    def _():
        acc_ref[...] = jnp.zeros_like(acc_ref)

    p = p_ref[...].astype(jnp.float32)
    l = l_ref[...].astype(jnp.float32)
    term = _pointwise_term(p, l, mode, beta)

    if needs_mask:
        blk = pl.program_id(0) * bps + t       # logical row-block index within this group

        @pl.when(blk < first_partial_blk)      # fully valid tiles: no mask arithmetic at all
        def _():
            acc_ref[...] += jnp.sum(term, axis=0, keepdims=True)

        @pl.when(blk >= first_partial_blk)     # only the tail tile pays for the iota mask
        def _():
            row_ids = lax.broadcasted_iota(jnp.int32, term.shape, 0)
            lane_ids = lax.broadcasted_iota(jnp.int32, term.shape, 1)
            elem = (blk * tile_rows + row_ids) * _LANES + lane_ids
            acc_ref[...] += jnp.sum(jnp.where(elem < n_valid, term, 0.0),
                                    axis=0, keepdims=True)
    else:
        acc_ref[...] += jnp.sum(term, axis=0, keepdims=True)

    @pl.when(t == bps - 1)
    def _():
        # Fold the cross-lane reduce and the static scale/denom into the epilogue
        # (runs once per (split, group), off the serial critical path).
        out_ref[...] = (jnp.sum(acc_ref[...]) * scale_over_denom).reshape(1, 1, 1, 1)


def _reduce_loss_grouped(preds, labels, mode, *, beta=1.0, denom=None, scale=1.0):
    """Per-group  scale * sum(term(pred_g, label_g)) / denom  in ONE pallas_call.

    All groups must share shape/dtype.  Returns a (G,) f32 array of losses.
    """
    G = len(preds)
    shape, dtype = preds[0].shape, preds[0].dtype
    for p, l in zip(preds, labels):
        assert p.shape == shape and l.shape == shape, 'pred/label shape mismatch'
    n = int(np.prod(shape))
    assert 0 < n < 2 ** 31, 'element index must fit in int32'
    if denom is None:
        denom = n

    pad = (-n) % _LANES
    rows = (n + pad) // _LANES

    def prep(x):
        xf = x.reshape(-1)
        if pad:                                # only copies when not lane-aligned
            xf = jnp.pad(xf, (0, pad))
        return xf.reshape(rows, _LANES)

    ps = [prep(x) for x in preds]
    ls = [prep(x) for x in labels]
    p3 = ps[0][None] if G == 1 else jnp.stack(ps)
    l3 = ls[0][None] if G == 1 else jnp.stack(ls)

    # Tile sizing: ~1 MiB of input rows per grid step (2048 f32 / 4096 bf16 rows).
    itemsize = max(1, jnp.dtype(dtype).itemsize)
    cap = max(8, _TILE_BYTES // (_LANES * itemsize))
    tile_rows = rows if rows <= cap else cap
    total_blocks = _cdiv(rows, tile_rows)

    # Split row blocks across TensorCores only on multi-TC chips; make the block count even
    # and exactly covered so both cores get equal work and no tile is duplicated.
    splits = 1
    if _num_tensorcores() >= 2 and rows >= 16:
        if total_blocks == 1:
            tile_rows = _roundup8(_cdiv(rows, 2))
            total_blocks = _cdiv(rows, tile_rows)
        elif total_blocks % 2:
            tr = _roundup8(_cdiv(rows, total_blocks + 1))
            tb = _cdiv(rows, tr)
            if tr <= cap and tb % 2 == 0:
                tile_rows, total_blocks = tr, tb
        if total_blocks % 2 == 0:
            splits = 2
    bps = total_blocks // splits               # exact cover: no clamped/over-covered blocks

    covered = total_blocks * tile_rows * _LANES
    needs_mask = covered != n
    first_partial_blk = n // (tile_rows * _LANES)

    kernel = functools.partial(
        _reduce_sum_kernel, mode=mode, beta=float(beta), n_valid=n,
        tile_rows=tile_rows, bps=bps, first_partial_blk=first_partial_blk,
        needs_mask=needs_mask, scale_over_denom=float(scale) / float(denom))

    in_spec = pl.BlockSpec((None, tile_rows, _LANES),
                           lambda s, g, t: (g, s * bps + t, 0))

    out = pl.pallas_call(
        kernel,
        out_shape=jax.ShapeDtypeStruct((G, splits, 1, 1), jnp.float32),
        grid_spec=pltpu.PrefetchScalarGridSpec(
            num_scalar_prefetch=0,
            grid=(splits, G, bps),
            in_specs=[in_spec, in_spec],
            out_specs=pl.BlockSpec((1, 1, 1, 1), lambda s, g, t: (g, s, 0, 0)),
            scratch_shapes=[pltpu.VMEM((1, _LANES), jnp.float32)],
        ),
        compiler_params=pltpu.CompilerParams(
            dimension_semantics=("parallel", "arbitrary", "arbitrary")),
    )(p3, l3)

    if splits == 1:
        return out[:, 0, 0, 0]
    return out.sum(axis=(1, 2, 3))


def _reduce_loss(pred, label, mode, **kw):
    return _reduce_loss_grouped([pred], [label], mode, **kw)[0]


# ---------------------------------------------------------------------------
# Quaternion loss kernel (lane-dense: batch on lanes, components on sublanes)
# ---------------------------------------------------------------------------
def _quat_kernel(p_ref, l_ref, out_ref, acc_ref, *, kind, batch, tile_b, n_tiles,
                 needs_mask):
    t = pl.program_id(0)

    @pl.when(t == 0)
    def _():
        acc_ref[...] = jnp.zeros_like(acc_ref)

    p = p_ref[...].astype(jnp.float32)          # (C, tile_b)
    l = l_ref[...].astype(jnp.float32)
    prod = p * l
    inner = prod[0:1, :]
    for c in range(1, prod.shape[0]):           # C-1 VALU adds; no per-row XLU reduce
        inner = inner + prod[c:c + 1, :]
    inner = jnp.clip(jnp.abs(inner), -1.0, 1.0)
    if kind == 'Cos':                           # CosSimilarityLoss
        per = jnp.arccos(inner)
    elif kind == 'CosDistance':                 # CosDistanceLoss
        per = 1.0 - inner
    elif kind == 'ExpCos':                      # ExpCosDistanceLossLoss
        per = jnp.exp(1.0 - inner)
    else:
        raise ValueError(f'Unknown quat loss type: {kind}')

    if needs_mask:
        first_partial = batch // tile_b

        @pl.when(t < first_partial)
        def _():
            acc_ref[...] += per

        @pl.when(t >= first_partial)
        def _():
            col = t * tile_b + lax.broadcasted_iota(jnp.int32, per.shape, 1)
            acc_ref[...] += jnp.where(col < batch, per, 0.0)
    else:
        acc_ref[...] += per

    @pl.when(t == n_tiles - 1)
    def _():
        out_ref[...] = (jnp.sum(acc_ref[...]) / jnp.float32(batch)).reshape(1, 1)


def _quat_loss(pred, label, kind):
    assert pred.shape == label.shape and pred.ndim == 2
    B, C = pred.shape
    pt = pred.T                                  # (C, B): batch lane-dense
    lt = label.T
    if B <= _QUAT_TILE_B:
        tile_b, n_tiles, needs_mask = B, 1, False
    else:
        tile_b = _QUAT_TILE_B
        n_tiles = _cdiv(B, tile_b)
        needs_mask = (n_tiles * tile_b != B)

    kernel = functools.partial(_quat_kernel, kind=kind, batch=B, tile_b=tile_b,
                               n_tiles=n_tiles, needs_mask=needs_mask)
    out = pl.pallas_call(
        kernel,
        out_shape=jax.ShapeDtypeStruct((1, 1), jnp.float32),
        grid_spec=pltpu.PrefetchScalarGridSpec(
            num_scalar_prefetch=0,
            grid=(n_tiles,),
            in_specs=[pl.BlockSpec((C, tile_b), lambda t: (0, t)),
                      pl.BlockSpec((C, tile_b), lambda t: (0, t))],
            out_specs=pl.BlockSpec((1, 1), lambda t: (0, 0)),
            scratch_shapes=[pltpu.VMEM((1, tile_b), jnp.float32)],
        ),
        compiler_params=pltpu.CompilerParams(dimension_semantics=("arbitrary",)),
    )(pt, lt)
    return out[0, 0]


# ---------------------------------------------------------------------------
# OriLossFunc.forward
# ---------------------------------------------------------------------------
def ori_loss_func(ori_pre_dict, ori_label_dict, *, ori_type, loss_type, beta=1.0):
    if ori_type == 'Euler':
        if loss_type not in ('L1', 'L2', 'SmoothL1'):
            raise ValueError(f'Unknown loss type: {loss_type}')
        val = _reduce_loss(ori_pre_dict['euler'], ori_label_dict['euler'],
                           loss_type, beta=beta)
        return {'euler_loss': val}

    if ori_type == 'Quat':
        if loss_type not in ('Cos', 'CosDistance', 'ExpCos'):
            raise ValueError(f'Unknown loss type: {loss_type}')
        return {'quat_loss': _quat_loss(ori_pre_dict['quat'], ori_label_dict['quat'],
                                        loss_type)}

    if ori_type == 'DiscreteEuler':
        keys = ('yaw_encode', 'pitch_encode', 'roll_encode')
        names = ('yaw_loss', 'pitch_loss', 'roll_loss')
        preds = [ori_pre_dict[k] for k in keys]
        labels = [ori_label_dict[k] for k in keys]

        def params(shape):
            n = int(np.prod(shape))
            if loss_type == 'CE':
                return 'CE', n // shape[1], -1.0
            if loss_type == 'L1':
                return 'L1', n, 1.0
            if loss_type == 'KL':
                return 'KL', shape[0], 1.0
            if loss_type == 'JS':
                return 'JS', shape[0], 0.5
            # TODO(synk): 'WassersteinLoss' needs per-row normalization + cumsum along the
            # last dim (CDF distance); not implemented as a Pallas kernel here.
            raise ValueError(f'Unknown loss type: {loss_type}')

        same = all(p.shape == preds[0].shape and p.dtype == preds[0].dtype
                   for p in preds + labels)
        if same:
            # Fused path: one pallas_call computes all three angle losses.
            mode, denom, scale = params(preds[0].shape)
            vals = _reduce_loss_grouped(preds, labels, mode, denom=denom, scale=scale)
            return {names[0]: vals[0], names[1]: vals[1], names[2]: vals[2]}
        out = {}
        for name, p, l in zip(names, preds, labels):
            mode, denom, scale = params(p.shape)
            out[name] = _reduce_loss(p, l, mode, denom=denom, scale=scale)
        return out

    raise ValueError(f'Unknown ori type: {ori_type}')


# ---------------------------------------------------------------------------
if __name__ == "__main__":
    key = jax.random.PRNGKey(0)
    keys = jax.random.split(key, 12)
    B = 8

    # --- Quat path: [B, 4] quaternions ---
    quat_p = jax.random.normal(keys[0], (B, 4), jnp.float32)
    quat_l = jax.random.normal(keys[1], (B, 4), jnp.float32)
    inner = jnp.clip(jnp.abs(jnp.sum(quat_p * quat_l, axis=1)), -1.0, 1.0)
    quat_refs = {'CosDistance': jnp.mean(1.0 - inner),
                 'ExpCos': jnp.mean(jnp.exp(1.0 - inner))}
    for lt, ref in quat_refs.items():
        out = ori_loss_func({'quat': quat_p}, {'quat': quat_l},
                            ori_type='Quat', loss_type=lt)
        got = jax.block_until_ready(out['quat_loss'])
        np.testing.assert_allclose(np.asarray(got), np.asarray(ref), rtol=1e-5, atol=1e-6)

    # --- Euler path: [B, 3] angles ---
    eu_p = jax.random.normal(keys[2], (B, 3), jnp.float32)
    eu_l = jax.random.normal(keys[3], (B, 3), jnp.float32)
    d = eu_p - eu_l
    euler_refs = {
        'L1': jnp.mean(jnp.abs(d)),
        'L2': jnp.mean(d * d),
        'SmoothL1': jnp.mean(jnp.where(jnp.abs(d) < 1.0, 0.5 * d * d, jnp.abs(d) - 0.5)),
    }
    for lt, ref in euler_refs.items():
        out = ori_loss_func({'euler': eu_p}, {'euler': eu_l},
                            ori_type='Euler', loss_type=lt)
        got = jax.block_until_ready(out['euler_loss'])
        np.testing.assert_allclose(np.asarray(got), np.asarray(ref), rtol=1e-5, atol=1e-6)

    # --- DiscreteEuler path (fused 3-angle kernel): [B, nbins] per angle ---
    nbins = 64
    pre_d, lab_d = {}, {}
    for i, k in enumerate(('yaw_encode', 'pitch_encode', 'roll_encode')):
        pre_d[k] = jax.random.normal(keys[4 + 2 * i], (B, nbins), jnp.float32)
        lab_d[k] = jax.nn.softmax(
            jax.random.normal(keys[5 + 2 * i], (B, nbins), jnp.float32), axis=1)

    def disc_ref(p, l, lt):
        if lt == 'CE':
            return -jnp.mean(jnp.sum(l * p, axis=1))
        if lt == 'KL':
            return jnp.sum(l * (jnp.log(l) - p)) / p.shape[0]
        if lt == 'JS':
            m = 0.5 * (jnp.exp(p) + l)
            js1 = jnp.sum(m * (jnp.log(m) - p)) / p.shape[0]
            js2 = jnp.sum(m * (jnp.log(m) - jnp.log(l + 1e-6))) / p.shape[0]
            return 0.5 * (js1 + js2)
        return jnp.mean(jnp.abs(p - l))          # 'L1'

    for lt in ('CE', 'L1', 'KL', 'JS'):
        out = ori_loss_func(pre_d, lab_d, ori_type='DiscreteEuler', loss_type=lt)
        for ang in ('yaw', 'pitch', 'roll'):
            got = jax.block_until_ready(out[f'{ang}_loss'])
            ref = disc_ref(pre_d[f'{ang}_encode'], lab_d[f'{ang}_encode'], lt)
            np.testing.assert_allclose(np.asarray(got), np.asarray(ref),
                                       rtol=1e-4, atol=1e-6)

    # --- Larger consistency check: multi-block tiles, gated tail mask on the last block,
    #     and (on multi-TC chips) the even 2-way core split. ---
    big_p = jax.random.normal(keys[10], (4000, 640), jnp.float32)
    big_l = jax.random.normal(keys[11], (4000, 640), jnp.float32)
    got = jax.block_until_ready(_reduce_loss(big_p, big_l, 'L2'))
    ref = jnp.mean((big_p - big_l) ** 2)
    np.testing.assert_allclose(np.asarray(got), np.asarray(ref), rtol=1e-4, atol=1e-6)

    print("KERNEL_OK")
</pallas_src>

<mosaic_0001>
module attributes {stable_mosaic.version = 11 : i64} {
  func.func @_quat_kernel(%arg0: i32, %arg1: memref<4x8xf32, #tpu.memory_space<vmem>>, %arg2: memref<4x8xf32, #tpu.memory_space<vmem>>, %arg3: memref<1x1xf32, #tpu.memory_space<vmem>>, %arg4: memref<1x8xf32, #tpu.memory_space<vmem>>) attributes {dimension_semantics = [#tpu.dimension_semantics<arbitrary>], iteration_bounds = array<i64: 1>, scalar_prefetch = 0 : i64, scratch_operands = 1 : i64, tpu.core_type = #tpu.core_type<tc>, window_params = [{transform_indices = @transform_0, window_bounds = array<i64: 4, 8>}, {transform_indices = @transform_1, window_bounds = array<i64: 4, 8>}, {pipeline_mode = #tpu.pipeline_mode<synchronous>, transform_indices = @transform_2, window_bounds = array<i64: 1, 1>}]} {
    %c0_i32 = arith.constant 0 : i32
    %0 = arith.cmpi eq, %arg0, %c0_i32 : i32
    %1 = arith.extui %0 : i1 to i32
    %c0_i32_0 = arith.constant 0 : i32
    %2 = arith.cmpi ne, %1, %c0_i32_0 : i32
    scf.if %2 {
      %cst_12 = arith.constant 0.000000e+00 : f32
      %26 = vector.broadcast %cst_12 : f32 to vector<1x8xf32>
      %c0_13 = arith.constant 0 : index
      %c0_14 = arith.constant 0 : index
      %27 = vector.load %arg4[%c0_13, %c0_14] : memref<1x8xf32, #tpu.memory_space<vmem>>, vector<1x8xf32>
      tpu.vector_store %arg4[%c0_13, %c0_14], %26 {strides = array<i32>} : memref<1x8xf32, #tpu.memory_space<vmem>>, vector<1x8xf32>,
    } else {
    }
    %c0 = arith.constant 0 : index
    %c0_1 = arith.constant 0 : index
    %3 = vector.load %arg1[%c0, %c0_1] : memref<4x8xf32, #tpu.memory_space<vmem>>, vector<4x8xf32>
    %c0_2 = arith.constant 0 : index
    %c0_3 = arith.constant 0 : index
    %4 = vector.load %arg2[%c0_2, %c0_3] : memref<4x8xf32, #tpu.memory_space<vmem>>, vector<4x8xf32>
    %5 = arith.mulf %3, %4 : vector<4x8xf32>
    %6 = vector.extract_strided_slice %5 {offsets = [0, 0], sizes = [1, 8], strides = [1, 1]} : vector<4x8xf32> to vector<1x8xf32>
    %7 = vector.extract_strided_slice %5 {offsets = [1, 0], sizes = [1, 8], strides = [1, 1]} : vector<4x8xf32> to vector<1x8xf32>
    %8 = arith.addf %6, %7 : vector<1x8xf32>
    %9 = vector.extract_strided_slice %5 {offsets = [2, 0], sizes = [1, 8], strides = [1, 1]} : vector<4x8xf32> to vector<1x8xf32>
    %10 = arith.addf %8, %9 : vector<1x8xf32>
    %11 = vector.extract_strided_slice %5 {offsets = [3, 0], sizes = [1, 8], strides = [1, 1]} : vector<4x8xf32> to vector<1x8xf32>
    %12 = arith.addf %10, %11 : vector<1x8xf32>
    %13 = math.absf %12 : vector<1x8xf32>
    %cst = arith.constant -1.000000e+00 : f32
    %cst_4 = arith.constant 1.000000e+00 : f32
    %14 = vector.broadcast %cst : f32 to vector<1x8xf32>
    %15 = arith.maximumf %14, %13 : vector<1x8xf32>
    %16 = vector.broadcast %cst_4 : f32 to vector<1x8xf32>
    %17 = arith.minimumf %16, %15 : vector<1x8xf32>
    %cst_5 = arith.constant 1.000000e+00 : f32
    %18 = vector.broadcast %cst_5 : f32 to vector<1x8xf32>
    %19 = arith.subf %18, %17 : vector<1x8xf32>
    %c0_6 = arith.constant 0 : index
    %c0_7 = arith.constant 0 : index
    %20 = vector.load %arg4[%c0_6, %c0_7] : memref<1x8xf32, #tpu.memory_space<vmem>>, vector<1x8xf32>
    %21 = arith.addf %20, %19 : vector<1x8xf32>
    %c0_8 = arith.constant 0 : index
    %c0_9 = arith.constant 0 : index
    %22 = vector.load %arg4[%c0_8, %c0_9] : memref<1x8xf32, #tpu.memory_space<vmem>>, vector<1x8xf32>
    tpu.vector_store %arg4[%c0_8, %c0_9], %21 {strides = array<i32>} : memref<1x8xf32, #tpu.memory_space<vmem>>, vector<1x8xf32>,
    %c0_i32_10 = arith.constant 0 : i32
    %23 = arith.cmpi eq, %arg0, %c0_i32_10 : i32
    %24 = arith.extui %23 : i1 to i32
    %c0_i32_11 = arith.constant 0 : i32
    %25 = arith.cmpi ne, %24, %c0_i32_11 : i32
    scf.if %25 {
      %c0_12 = arith.constant 0 : index
      %c0_13 = arith.constant 0 : index
      %26 = vector.load %arg4[%c0_12, %c0_13] : memref<1x8xf32, #tpu.memory_space<vmem>>, vector<1x8xf32>
      %27 = vector.shape_cast %26 : vector<1x8xf32> to vector<1x1x8xf32>
      %cst_14 = arith.constant dense<0.000000e+00> : vector<1xf32>
      %28 = vector.multi_reduction <add>, %27, %cst_14 [1, 2] : vector<1x1x8xf32> to vector<1xf32>
      %29 = vector.shape_cast %28 : vector<1xf32> to vector<1x1x1xf32>
      %30 = vector.extract %29[0, 0, 0] : f32 from vector<1x1x1xf32>
      %cst_15 = arith.constant 8.000000e+00 : f32
      %31 = arith.divf %30, %cst_15 : f32
      %32 = vector.broadcast %31 : f32 to vector<1x1xf32>
      %c0_16 = arith.constant 0 : index
      %c0_17 = arith.constant 0 : index
      %33 = vector.load %arg3[%c0_16, %c0_17] : memref<1x1xf32, #tpu.memory_space<vmem>>, vector<1x1xf32>
      tpu.vector_store %arg3[%c0_16, %c0_17], %32 {strides = array<i32>} : memref<1x1xf32, #tpu.memory_space<vmem>>, vector<1x1xf32>,
    } else {
    }
    return
  }
  func.func @transform_0(%arg0: i32) -> (i32, i32) {
    %c0_i32 = arith.constant 0 : i32
    %c0_i32_0 = arith.constant 0 : i32
    return %c0_i32, %arg0 : i32, i32
  }
  func.func @transform_1(%arg0: i32) -> (i32, i32) {
    %c0_i32 = arith.constant 0 : i32
    %c0_i32_0 = arith.constant 0 : i32
    return %c0_i32, %arg0 : i32, i32
  }
  func.func @transform_2(%arg0: i32) -> (i32, i32) {
    %c0_i32 = arith.constant 0 : i32
    %c0_i32_0 = arith.constant 0 : i32
    %c0_i32_1 = arith.constant 0 : i32
    return %c0_i32, %c0_i32_0 : i32, i32
  }
}

</mosaic_0001>

<bundles_post_ra>
// kernel: tpu_custom_call.1
= control target key start
LH: loop header
LB: loop body
LE: loop exit
PB: predicated region body
PF: predicated region fallthrough
CT: control target
= control target key end

     0   :  { %7 = vsyncpa [#allocation4], 0  ;;  %s203_s0 = inlined_call_operand.hbm [shape: f32[4,8], index: 0, kind: input, shape index: {}]   ;;  %s204_s1 = inlined_call_operand.hbm [shape: f32[4,8], index: 1, kind: input, shape index: {}]   ;;  %s205_s2 = inlined_call_operand.hbm [shape: f32[1,1], index: 2, kind: output, shape index: {}]  }
   0x1   :  { %8 = vsyncpa [#allocation7], 0 }
   0x2   :  { %9 = vsyncpa [#allocation5], 0  ;;  %s172_s9 = smov [#allocation3]   ;;  %s173_s11 = smov [#allocation6]  }
   0x3   :  { %s16_s10 = sshll.u32 %s172_s9, 4  ;;  %s26_s12 = sshll.u32 %s173_s11, 4  ;;  %s17_s10 = int_to_ptr.vmem [resolvable:$true] %s16_s10  ;;  %s27_s12 = int_to_ptr.vmem [resolvable:$true] %s26_s12 }
   0x4   :  { %s114_s13 = scalar_lea.vmem %s17_s10, 64  ;;  %p119_p1 = scmp.lt.s32.totalorder %s17_s10, %s17_s10 }
   0x5   :  { %p115_p0 = scmp.ne.s32.totalorder %s17_s10, %s114_s13  ;;  %p120_p2 = scmp.lt.s32.totalorder %s114_s13, %s114_s13 }
   0x7   :  { %p121_p3 = por %p120_p2, %p119_p1 }
   0x9   :  { %p122_p4 = pnand %p121_p3, %p115_p0 }
   0xb   :  { %125 = shalt.err (!%p122_p4)
}
   0xc   :  { %19 = dma.hbm_to_vmem [thread:$0]  %s203_s0, 64, %s17_s10, [#allocation4]  }
   0xd   :  { %s134_s16 = scalar_lea.vmem %s27_s12, 64  ;;  %p139_p6 = scmp.lt.s32.totalorder %s27_s12, %s27_s12 }
   0xe   :  { %p135_p5 = scmp.ne.s32.totalorder %s27_s12, %s134_s16  ;;  %p140_p7 = scmp.lt.s32.totalorder %s134_s16, %s134_s16 }
  0x10   :  { %p141_p8 = por %p140_p7, %p139_p6 }
  0x12   :  { %p142_p9 = pnand %p141_p8, %p135_p5 }
  0x14   :  { %145 = shalt.err (!%p142_p9)
}
  0x15   :  { %29 = dma.hbm_to_vmem [thread:$0]  %s204_s1, 64, %s27_s12, [#allocation7]  }
  0x16   :  { %166 = dma.done.wait [#allocation4], 64  }
  0x17   :  { %167 = vsyncadd [#allocation4], 4294967232 }
  0x18   :  { %168 = dma.done.wait [#allocation7], 64  }
  0x19   :  { %169 = vsyncadd [#allocation7], 4294967232  ;;  %vm40_vm0 = vcmask 57344   ;;  %v174_v0 = vmov 0.0   ;;  %v42_v1 = vld [vmem:[#allocation3] sm:$0xf] }
  0x1a   :  { %41 = vst.msk [vmem:[#allocation2] sm:$0x1] %vm40_vm0, %v174_v0  ;;  %v43_v2 = vld [vmem:[#allocation6] sm:$0xf]  ;;  %s175_s0 = smov [#allocation8]   ;;  %vm81_vm1 = vcmask 0  }
  0x1b   :  { %v44_v3 = vmul.f32 %v43_v2, %v42_v1  ;;  %s89_s1 = sshll.u32 %s175_s0, 4  ;;  %s90_s1 = int_to_ptr.vmem [resolvable:$true] %s89_s1 }
  0x1c   :  { %s146_s21 = scalar_lea.vmem %s90_s1, 16  ;;  %s150_s22 = scalar_lea.vmem %s90_s1, 32 }
  0x1d   :  { %v46_v4 = vrot.slane %v44_v3, 1  ;;  %v49_v5 = vrot.slane %v44_v3, 2  ;;  %v52_v7 = vrot.slane %v44_v3, 3  ;;  %p147_p10 = scmp.ne.s32.totalorder %s90_s1, %s146_s21  ;;  %p151_p11 = scmp.lt.s32.totalorder %s90_s1, %s90_s1 }
  0x1e   :  { %p152_p12 = scmp.lt.s32.totalorder %s150_s22, %s146_s21 }
  0x1f   :  { %v48_v6 = vadd.f32 %v46_v4, %v44_v3 }
  0x20   :  { %p153_p13 = por %p152_p12, %p151_p11 }
  0x21   :  { %v51_v8 = vadd.f32 %v49_v5, %v48_v6  ;;  %v59_v12 = vld [vmem:[#allocation2] sm:$0x1] }
  0x22   :  { %p154_p0 = pnand %p153_p13, %p147_p10 }
  0x23   :  { %v54_v9 = vadd.f32 %v52_v7, %v51_v8 }
  0x25   :  { %v55_v10 = vand.u32 2147483647, %v54_v9 }
  0x27   :  { %v99_v11 = vclamps-f32 %v55_v10, 1.0 }
  0x29   :  { %v58_v13 = vsub.f32 1.0, %v99_v11 }
  0x2b   :  { %v60_v14 = vadd.f32 %v59_v12, %v58_v13 }
  0x2d   :  { %62 = vst.msk [vmem:[#allocation2] sm:$0x1] %vm40_vm0, %v60_v14 }
  0x34   :  { %v66_v15 = vld [vmem:[#allocation2] sm:$0x1] }
  0x35   :  { %v67_v16 = vsel %vm40_vm0, %v66_v15, 0.0 }
  0x36   :  { %68 = vadd.xlane.f32.xlu0 %v67_v16 }
  0xbf   :  { %v69_v17 = vpop.xlane.xlu0 %68 }
  0xc0   :  { %v70_v18 = vrot.slane %v69_v17, 4 }
  0xc2   :  { %v71_v19 = vadd.f32 %v70_v18, %v69_v17 }
  0xc4   :  { %v72_v20 = vrot.slane %v71_v19, 2 }
  0xc6   :  { %v73_v21 = vadd.f32 %v72_v20, %v71_v19 }
  0xc8   :  { %v74_v22 = vrot.slane %v73_v21, 1 }
  0xca   :  { %v75_v23 = vadd.f32 %v74_v22, %v73_v21 }
  0xcc   :  { %100 = vpush %v75_v23 }
  0xfd   :  { %s101_s19 = spop %100 }
  0xfe   :  { %s79_s20 = smul.f32 0.125, %s101_s19 }
 0x100   :  { %v80_v24 = vstv %s79_s20 }
 0x101   :  { %82 = vst.msk [vmem:[#allocation8] sm:$0x1] %vm81_vm1, %v80_v24 }
 0x102   :  { %157 = shalt.err (!%p154_p0)
}
 0x103   :  { %92 = dma.vmem_to_hbm [thread:$0]  %s90_s1, 16, %s205_s2, [#allocation5]  }
 0x104   :  { %170 = dma.done.wait [#allocation5], 16  }
 0x105   :  { %171 = vsyncadd [#allocation5], 4294967280 }
 0x106   :  { %96 = vsyncpa [#allocation4], 1 }
 0x107   :  { %97 = vsyncpa [#allocation7], 1 }
 0x108   :  { %98 = vsyncpa [#allocation5], 1 }

</bundles_post_ra>
